<compile_context>
chip_gen: v7x
topology: tpu7x:2x2x1
jax: 0.10.0
libtpu: 0.0.40
codegen_flags: <defaults>
</compile_context>

<pallas_src>
import jax
import jax.numpy as jnp
from jax.experimental import pallas as pl
from jax.experimental.pallas import tpu as pltpu

_EPS = 1e-5
_LANE = 128
_DEFAULT_VMEM_BUDGET = 32 * 1024 * 1024   # target pipelined block footprint
_VMEM_LIMIT_BYTES = 48 * 1024 * 1024      # scoped VMEM limit handed to Mosaic
_MAX_ROW_TILE = 4096                      # rows; bounds the tile-size search


def _round_up(x, m):
    return (x + m - 1) // m * m


def _sublane(dtype):
    # sublane packing: 8 rows for 32-bit, 16 for 16-bit, 32 for 8-bit dtypes
    return max(8, 8 * (4 // jnp.dtype(dtype).itemsize))


def _make_fullrow_kernel(hw_true):
    """Each grid step sees the full (zero-padded) spatial extent of its rows."""
    inv_n = 1.0 / float(hw_true)

    def kernel(x_ref, o_ref):
        x = x_ref[...].astype(jnp.float32)
        # Fused single pass: sum and sum-of-squares (lane reductions -> XLU).
        # Zero padding in the lane tail contributes nothing to either; divide
        # by the true H*W, not the padded width.
        s = jnp.sum(x, axis=-1, keepdims=True)
        sq = jnp.sum(x * x, axis=-1, keepdims=True)
        mean = s * inv_n
        var = jnp.maximum(sq * inv_n - mean * mean, 0.0)   # biased variance
        inv_std = jax.lax.rsqrt(var + _EPS)
        o_ref[...] = ((x - mean) * inv_std).astype(o_ref.dtype)

    return kernel


def _make_stats_kernel(hw_true, n_chunks):
    """Accumulate per-row sum / sum-of-squares across spatial chunks."""
    inv_n = 1.0 / float(hw_true)

    def kernel(x_ref, mean_ref, rstd_ref, s_acc, sq_acc):
        j = pl.program_id(1)

        @pl.when(j == 0)
        def _():
            s_acc[...] = jnp.zeros_like(s_acc)
            sq_acc[...] = jnp.zeros_like(sq_acc)

        x = x_ref[...].astype(jnp.float32)
        s_acc[...] += jnp.sum(x, axis=-1, keepdims=True)
        sq_acc[...] += jnp.sum(x * x, axis=-1, keepdims=True)

        @pl.when(j == n_chunks - 1)
        def _():
            mean = s_acc[...] * inv_n
            var = jnp.maximum(sq_acc[...] * inv_n - mean * mean, 0.0)
            mean_ref[...] = mean
            rstd_ref[...] = jax.lax.rsqrt(var + _EPS)

    return kernel


def _normalize_kernel(x_ref, mean_ref, rstd_ref, o_ref):
    x = x_ref[...].astype(jnp.float32)
    o_ref[...] = ((x - mean_ref[...]) * rstd_ref[...]).astype(o_ref.dtype)


def _pick_row_tile(bc, hw_p, itemsize, sub, budget):
    """Largest sublane-aligned row tile within the pipelined VMEM budget,
    trading off row-padding (extra HBM traffic) against per-step overhead."""
    bytes_per_row = 4 * hw_p * itemsize            # 2 pipeline bufs x (in+out)
    tr_max = max(sub, (budget // bytes_per_row) // sub * sub)
    tr_max = min(tr_max, _round_up(bc, sub), _MAX_ROW_TILE)
    if bc >= 2 * sub:                              # keep >= 2 grid steps (v7x)
        tr_max = min(tr_max, _round_up((bc + 1) // 2, sub))
    # per-step pipeline overhead (~0.35 us) expressed in rows of HBM traffic
    overhead_rows = max(1, 350_000 // (2 * hw_p * itemsize))
    best_tr, best_cost = sub, None
    for t in range(sub, tr_max + 1, sub):
        rows = _round_up(bc, t)                    # traffic incl. row padding
        cost = rows + (rows // t) * overhead_rows
        if best_cost is None or cost < best_cost:
            best_tr, best_cost = t, cost
    return best_tr


def adain_forward(x, *, vmem_budget_bytes=_DEFAULT_VMEM_BUDGET):
    """x: (b, c, H, W) -> (b, c, H, W), instance-normalized per (b, c)."""
    b, c, H, W = x.shape
    bc, hw = b * c, H * W
    dtype = x.dtype
    itemsize = jnp.dtype(dtype).itemsize
    sub = _sublane(dtype)
    hw_p = _round_up(hw, _LANE)

    x2 = x.reshape(bc, hw)

    if sub * 4 * hw_p * itemsize <= vmem_budget_bytes:
        # --- single-pass path: full spatial extent per row tile ---
        tr = _pick_row_tile(bc, hw_p, itemsize, sub, vmem_budget_bytes)
        bc_p = _round_up(bc, tr)
        xp = x2
        if (bc_p, hw_p) != (bc, hw):
            xp = jnp.pad(x2, ((0, bc_p - bc), (0, hw_p - hw)))

        out = pl.pallas_call(
            _make_fullrow_kernel(hw),
            out_shape=jax.ShapeDtypeStruct((bc_p, hw_p), dtype),
            grid_spec=pltpu.PrefetchScalarGridSpec(
                num_scalar_prefetch=0,
                grid=(bc_p // tr,),
                in_specs=[pl.BlockSpec((tr, hw_p), lambda i: (i, 0))],
                out_specs=pl.BlockSpec((tr, hw_p), lambda i: (i, 0)),
            ),
            compiler_params=pltpu.CompilerParams(
                dimension_semantics=("parallel",),
                vmem_limit_bytes=_VMEM_LIMIT_BYTES,
            ),
        )(xp)
    else:
        # --- two-pass path for very large H*W: stats sweep, then normalize ---
        tr = sub
        chunk = max(_LANE,
                    (vmem_budget_bytes // (4 * tr * itemsize)) // _LANE * _LANE)
        hw_p = _round_up(hw, chunk)
        n_chunks = hw_p // chunk
        bc_p = _round_up(bc, tr)
        xp = x2
        if (bc_p, hw_p) != (bc, hw):
            xp = jnp.pad(x2, ((0, bc_p - bc), (0, hw_p - hw)))

        mean, rstd = pl.pallas_call(
            _make_stats_kernel(hw, n_chunks),
            out_shape=(jax.ShapeDtypeStruct((bc_p, 1), jnp.float32),
                       jax.ShapeDtypeStruct((bc_p, 1), jnp.float32)),
            grid_spec=pltpu.PrefetchScalarGridSpec(
                num_scalar_prefetch=0,
                grid=(bc_p // tr, n_chunks),
                in_specs=[pl.BlockSpec((tr, chunk), lambda i, j: (i, j))],
                out_specs=[pl.BlockSpec((tr, 1), lambda i, j: (i, 0)),
                           pl.BlockSpec((tr, 1), lambda i, j: (i, 0))],
                scratch_shapes=[pltpu.VMEM((tr, 1), jnp.float32),
                                pltpu.VMEM((tr, 1), jnp.float32)],
            ),
            compiler_params=pltpu.CompilerParams(
                dimension_semantics=("parallel", "arbitrary"),
                vmem_limit_bytes=_VMEM_LIMIT_BYTES,
            ),
        )(xp)

        out = pl.pallas_call(
            _normalize_kernel,
            out_shape=jax.ShapeDtypeStruct((bc_p, hw_p), dtype),
            grid_spec=pltpu.PrefetchScalarGridSpec(
                num_scalar_prefetch=0,
                grid=(bc_p // tr, n_chunks),
                in_specs=[pl.BlockSpec((tr, chunk), lambda i, j: (i, j)),
                          pl.BlockSpec((tr, 1), lambda i, j: (i, 0)),
                          pl.BlockSpec((tr, 1), lambda i, j: (i, 0))],
                out_specs=pl.BlockSpec((tr, chunk), lambda i, j: (i, j)),
            ),
            compiler_params=pltpu.CompilerParams(
                dimension_semantics=("parallel", "parallel"),
                vmem_limit_bytes=_VMEM_LIMIT_BYTES,
            ),
        )(xp, mean, rstd)

    return out[:bc, :hw].reshape(b, c, H, W)


def adain_reference(x):
    b, c, H, W = x.shape
    xf = x.reshape(b, c, H * W).astype(jnp.float32)
    mean = jnp.mean(xf, axis=-1, keepdims=True)
    var = jnp.mean((xf - mean) ** 2, axis=-1, keepdims=True)
    out = (xf - mean) / jnp.sqrt(var + _EPS)
    return out.reshape(b, c, H, W).astype(x.dtype)


if __name__ == "__main__":
    # TODO(synk): the momentum update of adaptive_mean/adaptive_var mutates
    # module buffers only (via a temporary copy) and never affects the forward
    # output, so it is intentionally not implemented.
    b, c, H, W = 2, 4, 16, 16  # n_features = c = 4
    key = jax.random.PRNGKey(0)
    x = jax.random.normal(key, (b, c, H, W), dtype=jnp.float32)

    out = jax.block_until_ready(jax.jit(adain_forward)(x))
    assert out.shape == (b, c, H, W)
    assert jnp.allclose(out, adain_reference(x), atol=1e-5, rtol=1e-5), \
        "mismatch vs reference (aligned shape)"

    # Odd shape: bc not a multiple of 8, H*W not a multiple of 128 (padding path).
    x_odd = jax.random.normal(jax.random.PRNGKey(1), (3, 3, 7, 7), jnp.float32)
    out_odd = jax.block_until_ready(adain_forward(x_odd))
    assert jnp.allclose(out_odd, adain_reference(x_odd), atol=1e-4, rtol=1e-4), \
        "mismatch vs reference (padded shape)"

    # Exercise the large-H*W two-pass path by forcing a tiny VMEM budget.
    x_big = jax.random.normal(jax.random.PRNGKey(2), (2, 4, 16, 32), jnp.float32)
    out_big = jax.block_until_ready(
        adain_forward(x_big, vmem_budget_bytes=32 * 1024))
    assert jnp.allclose(out_big, adain_reference(x_big), atol=1e-4, rtol=1e-4), \
        "mismatch vs reference (two-pass path)"

    print("KERNEL_OK")
</pallas_src>

<mosaic_0001>
module attributes {stable_mosaic.version = 11 : i64} {
  func.func @kernel(%arg0: i32, %arg1: memref<8x256xf32, #tpu.memory_space<vmem>>, %arg2: memref<8x256xf32, #tpu.memory_space<vmem>>) attributes {dimension_semantics = [#tpu.dimension_semantics<parallel>], iteration_bounds = array<i64: 1>, scalar_prefetch = 0 : i64, scratch_operands = 0 : i64, tpu.core_type = #tpu.core_type<tc>, window_params = [{transform_indices = @transform_0, window_bounds = array<i64: 8, 256>}, {transform_indices = @transform_1, window_bounds = array<i64: 8, 256>}]} {
    %c0 = arith.constant 0 : index
    %c0_0 = arith.constant 0 : index
    %0 = vector.load %arg1[%c0, %c0_0] : memref<8x256xf32, #tpu.memory_space<vmem>>, vector<8x256xf32>
    %cst = arith.constant dense<0.000000e+00> : vector<8xf32>
    %1 = vector.multi_reduction <add>, %0, %cst [1] : vector<8x256xf32> to vector<8xf32>
    %2 = vector.shape_cast %1 : vector<8xf32> to vector<8x1xf32>
    %3 = arith.mulf %0, %0 : vector<8x256xf32>
    %cst_1 = arith.constant dense<0.000000e+00> : vector<8xf32>
    %4 = vector.multi_reduction <add>, %3, %cst_1 [1] : vector<8x256xf32> to vector<8xf32>
    %5 = vector.shape_cast %4 : vector<8xf32> to vector<8x1xf32>
    %cst_2 = arith.constant 3.906250e-03 : f32
    %6 = vector.broadcast %cst_2 : f32 to vector<8x1xf32>
    %7 = arith.mulf %2, %6 : vector<8x1xf32>
    %cst_3 = arith.constant 3.906250e-03 : f32
    %8 = vector.broadcast %cst_3 : f32 to vector<8x1xf32>
    %9 = arith.mulf %5, %8 : vector<8x1xf32>
    %10 = arith.mulf %7, %7 : vector<8x1xf32>
    %11 = arith.subf %9, %10 : vector<8x1xf32>
    %cst_4 = arith.constant 0.000000e+00 : f32
    %12 = vector.broadcast %cst_4 : f32 to vector<8x1xf32>
    %13 = arith.maximumf %11, %12 : vector<8x1xf32>
    %cst_5 = arith.constant 9.99999974E-6 : f32
    %14 = vector.broadcast %cst_5 : f32 to vector<8x1xf32>
    %15 = arith.addf %13, %14 : vector<8x1xf32>
    %16 = math.rsqrt %15 : vector<8x1xf32>
    %17 = vector.broadcast %7 : vector<8x1xf32> to vector<8x256xf32>
    %18 = arith.subf %0, %17 : vector<8x256xf32>
    %19 = vector.broadcast %16 : vector<8x1xf32> to vector<8x256xf32>
    %20 = arith.mulf %18, %19 : vector<8x256xf32>
    %c0_6 = arith.constant 0 : index
    %c0_7 = arith.constant 0 : index
    %21 = vector.load %arg2[%c0_6, %c0_7] : memref<8x256xf32, #tpu.memory_space<vmem>>, vector<8x256xf32>
    tpu.vector_store %arg2[%c0_6, %c0_7], %20 {strides = array<i32>} : memref<8x256xf32, #tpu.memory_space<vmem>>, vector<8x256xf32>,
    return
  }
  func.func @transform_0(%arg0: i32) -> (i32, i32) {
    %c0_i32 = arith.constant 0 : i32
    %c0_i32_0 = arith.constant 0 : i32
    return %arg0, %c0_i32 : i32, i32
  }
  func.func @transform_1(%arg0: i32) -> (i32, i32) {
    %c0_i32 = arith.constant 0 : i32
    %c0_i32_0 = arith.constant 0 : i32
    return %arg0, %c0_i32 : i32, i32
  }
}

</mosaic_0001>

<bundles_post_ra>
// kernel: adain_forward.1
= control target key start
LH: loop header
LB: loop body
LE: loop exit
PB: predicated region body
PF: predicated region fallthrough
CT: control target
= control target key end

     0   :  { %s59_s0 = inlined_call_operand.vmem [shape: f32[8,256], index: 0, kind: input, shape index: {}]   ;;  %s60_s1 = inlined_call_operand.vmem [shape: f32[8,256], index: 1, kind: output, shape index: {}]  }
   0x1   :  { %v8_v0 = vld [vmem:[%s59_s0] sm:$0xff]  ;;  %v9_v1 = vld [vmem:[%s59_s0 + $0x8] sm:$0xff] }
   0x2   :  { %v10_v2 = vadd.f32 %v9_v1, %v8_v0  ;;  %v13_v3 = vmul.f32 %v8_v0, %v8_v0  ;;  %v14_v4 = vmul.f32 %v9_v1, %v9_v1 }
   0x4   :  { %11 = vadd.xlane.f32.xlu0 %v10_v2  ;;  %v15_v5 = vadd.f32 %v14_v4, %v13_v3 }
   0x8   :  { %16 = vadd.xlane.f32.xlu0 %v15_v5 }
  0x91   :  { %v12_v6 = vpop.xlane.xlu0 %11 }
  0x92   :  { %v18_v7 = vmul.f32 0.00390625, %v12_v6 }
  0x94   :  { %v20_v9 = vmul.f32 %v18_v7, %v18_v7  ;;  %v25_v14 = vsub.f32 %v8_v0, %v18_v7  ;;  %v26_v15 = vsub.f32 %v9_v1, %v18_v7 }
  0x95   :  { %v17_v8 = vpop.xlane.xlu0 %16 }
  0x96   :  { %v19_v10 = vmul.f32 0.00390625, %v17_v8 }
  0x98   :  { %v21_v11 = vsub.f32 %v19_v10, %v20_v9 }
  0x9a   :  { %v22_v12 = vmax.f32 %v21_v11, 0.0 }
  0x9c   :  { %v23_v13 = vadd.f32 1e-05, %v22_v12 }
  0x9e   :  { %35 = vrsqrt.f32 %v23_v13 }
  0xa8   :  { %v36_v16 = vpop.eup %35 }
  0xa9   :  { %v27_v17 = vmul.f32 %v36_v16, %v25_v14  ;;  %v28_v18 = vmul.f32 %v36_v16, %v26_v15 }
  0xab   :  { %29 = vst [vmem:[%s60_s1] sm:$0xff] %v27_v17  ;;  %30 = vst [vmem:[%s60_s1 + $0x8] sm:$0xff] %v28_v18 }

</bundles_post_ra>
